<compile_context>
chip_gen: v7x
topology: tpu7x:2x2x1
jax: 0.10.0
libtpu: 0.0.40
codegen_flags: <defaults>
</compile_context>

<pallas_src>
import functools

import jax
import jax.numpy as jnp
from jax.experimental import pallas as pl
from jax.experimental.pallas import tpu as pltpu

EMBED_DIM = 512
_MIB = 1024 * 1024


def _round_up(x, m):
    return ((x + m - 1) // m) * m


def _tpu_params():
    """Returns (k_chunk, vmem_capacity_bytes) for the current TPU generation."""
    try:
        kind = jax.devices()[0].device_kind.lower()
    except Exception:  # defensive: never let introspection break the kernel
        kind = ""
    is_v5e = ("v5e" in kind) or ("v5 lite" in kind) or ("v5litepod" in kind)
    kc = 128 if is_v5e else 256  # match MXU panel width (v5e MXU is 4x128x128)
    try:
        vmem_cap = int(pltpu.get_tpu_info().vmem_capacity_bytes)
    except Exception:
        vmem_cap = 64 * _MIB     # v7x per-TensorCore worst case
    return kc, vmem_cap


def _choose_tm(n, tm_pref):
    """Sublane-aligned row tile; keep >=2 tiles when possible so the 'parallel'
    grid axis can be split across both v7x TensorCores."""
    n8 = max(8, _round_up(n, 8))
    tm = max(8, min(tm_pref, n8))
    if n8 >= 16 and n8 // tm < 2:
        tm = max(8, ((n8 // 2) // 8) * 8)
    return tm


# ---------------------------------------------------------------------------
# Path 1: small/medium vocab — VMEM-resident table, K-chunked one-hot @ table.
# ---------------------------------------------------------------------------
def _onehot_kernel(idx_ref, table_ref, out_ref, *, kc, nk):
    # idx_ref:   (TM, 1)     int32  — tile of flattened indices
    # table_ref: (C_pad, D)  f32    — full table, VMEM resident (DMA'd once)
    # out_ref:   (TM, D)     f32
    tm = out_ref.shape[0]
    ids = idx_ref[...]                                            # (TM, 1)
    # One (TM, KC) lane iota reused for every vocab chunk (ids are shifted
    # instead of regenerating a (TM, C) iota per tile).
    iota = jax.lax.broadcasted_iota(jnp.int32, (tm, kc), 1)

    def chunk(off):
        onehot = (iota == (ids - off)).astype(jnp.float32)        # exact 0/1
        tk = table_ref[pl.ds(off, kc), :]                         # (KC, D)
        return jnp.dot(onehot, tk, preferred_element_type=jnp.float32)

    out_ref[...] = chunk(0).astype(out_ref.dtype)
    if nk > 1:
        @pl.loop(1, nk)
        def _(k):
            off = pl.multiple_of(k * kc, kc)
            out_ref[...] += chunk(off).astype(out_ref.dtype)


def _embedding_mxu(flat, table, *, tm, kc, vmem_cap):
    n = flat.shape[0]
    num_classes, d = table.shape
    n_pad = _round_up(n, tm)
    if n_pad != n:
        flat = jnp.pad(flat, (0, n_pad - n))

    # Pad the class dim so the K loop uses uniform (kc, D) panels.
    kc = min(kc, _round_up(num_classes, 8))
    c_pad = _round_up(num_classes, kc)
    if c_pad != num_classes:
        table = jnp.pad(table, ((0, c_pad - num_classes), (0, 0)))
    nk = c_pad // kc
    grid = (n_pad // tm,)

    table_bytes = c_pad * d * table.dtype.itemsize
    # 2x table (pipeline buffers; DMA'd once) + 2x out tile + idx + slack.
    vmem_need = 2 * table_bytes + 2 * tm * d * 4 + 2 * tm * 4 + 8 * _MIB
    vmem_limit = min(max(32 * _MIB, vmem_need), max(vmem_cap - 2 * _MIB, 32 * _MIB))

    out = pl.pallas_call(
        functools.partial(_onehot_kernel, kc=kc, nk=nk),
        out_shape=jax.ShapeDtypeStruct((n_pad, d), table.dtype),
        grid_spec=pltpu.PrefetchScalarGridSpec(
            num_scalar_prefetch=0,
            grid=grid,
            in_specs=[
                pl.BlockSpec((tm, 1), lambda i: (i, 0)),
                # Constant index_map: the table is DMA'd into VMEM once and
                # stays resident for every row tile.
                pl.BlockSpec((c_pad, d), lambda i: (0, 0)),
            ],
            out_specs=pl.BlockSpec((tm, d), lambda i: (i, 0)),
        ),
        compiler_params=pltpu.CompilerParams(
            dimension_semantics=("parallel",),
            vmem_limit_bytes=int(vmem_limit),
        ),
        cost_estimate=pl.CostEstimate(
            flops=2 * n_pad * c_pad * d,
            transcendentals=0,
            bytes_accessed=n_pad * d * 4 + table_bytes + n_pad * 4,
        ),
    )(flat.reshape(n_pad, 1), table)
    return out[:n]


# ---------------------------------------------------------------------------
# Path 2: large vocab — HBM table + per-row DMA gather (nbuf copies in flight).
# ---------------------------------------------------------------------------
def _dma_kernel(idx_ref, table_hbm, out_ref, sems, *, nbuf, num_classes):
    # idx_ref:   SMEM (N_chunk,) int32 — this chunk's indices (scalar prefetch)
    # table_hbm: HBM  (C, D) f32       — never copied wholesale
    # out_ref:   VMEM (TM, D) f32      — rows are DMA'd straight into the tile
    # sems:      DMA semaphores (NBUF,)
    tm = out_ref.shape[0]
    base = pl.program_id(0) * tm
    mask = nbuf - 1                       # nbuf is a power of two

    def read_idx(row):
        # Clamp so a bad index can never become an out-of-bounds HBM DMA.
        return jnp.clip(idx_ref[base + row], 0, num_classes - 1)

    def issue(row, cls):
        pltpu.make_async_copy(
            table_hbm.at[cls], out_ref.at[row], sems.at[row & mask]).start()

    def retire(row):
        # Only the dst shape matters for the wait byte count.
        pltpu.make_async_copy(
            table_hbm.at[0], out_ref.at[row], sems.at[row & mask]).wait()

    # Prime nbuf outstanding row copies ...
    @pl.loop(0, nbuf)
    def _(r):
        issue(r, read_idx(r))

    # ... steady state: read the next index BEFORE the semaphore wait (a DMA
    # wait breaks SMEM sst->sld forwarding), retire the slot, reuse it ...
    @pl.loop(nbuf, tm)
    def _(r):
        cls = read_idx(r)
        retire(r - nbuf)
        issue(r, cls)

    # ... drain the tail before the pipeline writes the tile back.
    @pl.loop(tm - nbuf, tm)
    def _(r):
        retire(r)


def _embedding_dma_chunk(flat_chunk, table, *, tm, nbuf):
    n_pad = flat_chunk.shape[0]           # multiple of tm by construction
    num_classes, d = table.shape
    grid = (n_pad // tm,)
    return pl.pallas_call(
        functools.partial(_dma_kernel, nbuf=nbuf, num_classes=num_classes),
        out_shape=jax.ShapeDtypeStruct((n_pad, d), table.dtype),
        grid_spec=pltpu.PrefetchScalarGridSpec(
            num_scalar_prefetch=1,                          # chunk indices -> SMEM
            grid=grid,
            in_specs=[pl.BlockSpec(memory_space=pl.ANY)],   # table stays in HBM
            out_specs=pl.BlockSpec((tm, d), lambda i, idx: (i, 0)),
            scratch_shapes=[pltpu.SemaphoreType.DMA((nbuf,))],
        ),
        compiler_params=pltpu.CompilerParams(
            dimension_semantics=("parallel",),
        ),
        cost_estimate=pl.CostEstimate(
            flops=0,
            transcendentals=0,
            bytes_accessed=2 * n_pad * d * 4 + n_pad * 4,
        ),
    )(flat_chunk, table)


def _embedding_dma(flat, table, *, tm, nbuf, max_chunk_indices=32768):
    n = flat.shape[0]
    nbuf = max(1, min(nbuf, tm))
    nbuf = 1 << (nbuf.bit_length() - 1)   # power of two -> slot = row & (nbuf-1)
    n_pad = _round_up(n, tm)
    if n_pad != n:
        flat = jnp.pad(flat, (0, n_pad - n))   # padded rows gather row 0, sliced off
    # Bound the per-call SMEM index prefetch (1-D SMEM pads to next_pow2(4N)).
    chunk = max(tm, (max_chunk_indices // tm) * tm)
    parts = []
    for s in range(0, n_pad, chunk):
        parts.append(_embedding_dma_chunk(flat[s:s + chunk], table, tm=tm, nbuf=nbuf))
    out = parts[0] if len(parts) == 1 else jnp.concatenate(parts, axis=0)
    return out[:n]


# ---------------------------------------------------------------------------
# Public entry point.
# ---------------------------------------------------------------------------
def embedding_forward(indices, table, *, tm_mxu=256, tm_dma=512, nbuf=16,
                      vmem_table_budget=None, path=None):
    """indices: int array of any shape; table: (num_classes, 512) float32.

    Returns indices.shape + (512,), matching torch.nn.Embedding for in-range
    indices.
    """
    orig_shape = indices.shape
    flat = indices.reshape(-1).astype(jnp.int32)
    n = flat.shape[0]
    num_classes, d = table.shape

    kc, vmem_cap = _tpu_params()
    table_bytes = int(num_classes) * int(d) * table.dtype.itemsize
    if vmem_table_budget is None:
        # Table blocks are double-buffered by the pipeline (constant index_map
        # -> DMA'd only once, but 2 buffers), so budget the single-copy size at
        # ~1/4 of physical VMEM: ~24 MiB on v5e/v6e (128 MiB), ~14 MiB on v7x.
        vmem_table_budget = min(max(vmem_cap - 8 * _MIB, _MIB) // 4, 24 * _MIB)
    if path is None:
        path = "mxu" if table_bytes <= vmem_table_budget else "dma"

    if path == "mxu":
        tm = _choose_tm(n, tm_mxu)
        out = _embedding_mxu(flat, table, tm=tm, kc=kc, vmem_cap=vmem_cap)
    else:
        tm = _choose_tm(n, tm_dma)
        out = _embedding_dma(flat, table, tm=tm, nbuf=nbuf)
    return out.reshape(*orig_shape, d)


if __name__ == "__main__":
    key = jax.random.PRNGKey(0)
    k_tbl, k_idx, k_tbl2, k_idx2 = jax.random.split(key, 4)

    # --- Test 1: tiny vocab, shapes matching the module's typical use ---------
    num_classes = 16
    batch, seq = 2, 8
    table = jax.random.normal(k_tbl, (num_classes, EMBED_DIM), dtype=jnp.float32)
    x = jax.random.randint(k_idx, (batch, seq), 0, num_classes, dtype=jnp.int32)
    ref = table[x]

    out_mxu = jax.block_until_ready(embedding_forward(x, table))          # auto: MXU
    assert out_mxu.shape == (batch, seq, EMBED_DIM), out_mxu.shape
    assert jnp.allclose(out_mxu, ref), "mxu path mismatch vs reference gather"

    out_dma = jax.block_until_ready(embedding_forward(x, table, path="dma"))
    assert out_dma.shape == (batch, seq, EMBED_DIM), out_dma.shape
    assert jnp.allclose(out_dma, ref), "dma path mismatch vs reference gather"

    # --- Test 2: non-multiple vocab (exercises K-chunking / class padding) ----
    num_classes2, n2 = 300, 40
    table2 = jax.random.normal(k_tbl2, (num_classes2, EMBED_DIM), dtype=jnp.float32)
    x2 = jax.random.randint(k_idx2, (n2,), 0, num_classes2, dtype=jnp.int32)
    ref2 = table2[x2]

    out2_mxu = jax.block_until_ready(embedding_forward(x2, table2, path="mxu"))
    assert out2_mxu.shape == (n2, EMBED_DIM), out2_mxu.shape
    assert jnp.allclose(out2_mxu, ref2), "mxu path (chunked K) mismatch"

    out2_dma = jax.block_until_ready(embedding_forward(x2, table2, path="dma"))
    assert out2_dma.shape == (n2, EMBED_DIM), out2_dma.shape
    assert jnp.allclose(out2_dma, ref2), "dma path mismatch (test 2)"

    print("KERNEL_OK")
</pallas_src>

<mosaic_0001>
module attributes {stable_mosaic.version = 11 : i64} {
  func.func @_onehot_kernel(%arg0: i32, %arg1: memref<8x1xi32, #tpu.memory_space<vmem>>, %arg2: memref<16x512xf32, #tpu.memory_space<vmem>>, %arg3: memref<8x512xf32, #tpu.memory_space<vmem>>) attributes {dimension_semantics = [#tpu.dimension_semantics<parallel>], iteration_bounds = array<i64: 2>, scalar_prefetch = 0 : i64, scratch_operands = 0 : i64, tpu.core_type = #tpu.core_type<tc>, window_params = [{transform_indices = @transform_0, window_bounds = array<i64: 8, 1>}, {pipeline_mode = #tpu.pipeline_mode<synchronous>, transform_indices = @transform_1, window_bounds = array<i64: 16, 512>}, {transform_indices = @transform_2, window_bounds = array<i64: 8, 512>}]} {
    %c0 = arith.constant 0 : index
    %c0_0 = arith.constant 0 : index
    %0 = vector.load %arg1[%c0, %c0_0] : memref<8x1xi32, #tpu.memory_space<vmem>>, vector<8x1xi32>
    %1 = tpu.iota {dimensions = array<i32: 1>} : vector<8x16xi32>
    %c0_i32 = arith.constant 0 : i32
    %2 = vector.broadcast %c0_i32 : i32 to vector<8x1xi32>
    %3 = arith.subi %0, %2 : vector<8x1xi32>
    %4 = vector.broadcast %3 : vector<8x1xi32> to vector<8x16xi32>
    %5 = arith.cmpi eq, %1, %4 : vector<8x16xi32>
    %6 = arith.extui %5 : vector<8x16xi1> to vector<8x16xi32>
    %7 = arith.sitofp %6 : vector<8x16xi32> to vector<8x16xf32>
    %c0_1 = arith.constant 0 : index
    %c0_2 = arith.constant 0 : index
    %8 = vector.load %arg2[%c0_1, %c0_2] : memref<16x512xf32, #tpu.memory_space<vmem>>, vector<16x512xf32>
    %cst = arith.constant dense<0.000000e+00> : vector<8x512xf32>
    %9 = tpu.matmul %7, %8, %cst {dimension_numbers = #tpu.dot_dimension_numbers<[1], [0], [0], [1], [0, 0, 1, 1], [], []>} : vector<8x16xf32>, vector<16x512xf32>, vector<8x512xf32> -> vector<8x512xf32>
    %c0_3 = arith.constant 0 : index
    %c0_4 = arith.constant 0 : index
    %10 = vector.load %arg3[%c0_3, %c0_4] : memref<8x512xf32, #tpu.memory_space<vmem>>, vector<8x512xf32>
    tpu.vector_store %arg3[%c0_3, %c0_4], %9 {strides = array<i32>} : memref<8x512xf32, #tpu.memory_space<vmem>>, vector<8x512xf32>,
    return
  }
  func.func @transform_0(%arg0: i32) -> (i32, i32) {
    %c0_i32 = arith.constant 0 : i32
    %c0_i32_0 = arith.constant 0 : i32
    return %arg0, %c0_i32 : i32, i32
  }
  func.func @transform_1(%arg0: i32) -> (i32, i32) {
    %c0_i32 = arith.constant 0 : i32
    %c0_i32_0 = arith.constant 0 : i32
    %c0_i32_1 = arith.constant 0 : i32
    return %c0_i32, %c0_i32_0 : i32, i32
  }
  func.func @transform_2(%arg0: i32) -> (i32, i32) {
    %c0_i32 = arith.constant 0 : i32
    %c0_i32_0 = arith.constant 0 : i32
    return %arg0, %c0_i32 : i32, i32
  }
}

</mosaic_0001>

<bundles_post_ra>
// kernel: tpu_custom_call.1
= control target key start
LH: loop header
LB: loop body
LE: loop exit
PB: predicated region body
PF: predicated region fallthrough
CT: control target
= control target key end

     0   :  { %7 = vsyncpa [#allocation3], 0  ;;  %s739_s0 = inlined_call_operand.vmem [shape: s32[16,1], index: 0, kind: input, shape index: {}]   ;;  %s740_s1 = inlined_call_operand.hbm [shape: f32[16,512], index: 1, kind: input, shape index: {}]   ;;  %s741_s2 = inlined_call_operand.hbm [shape: f32[16,512], index: 2, kind: output, shape index: {}]  }
   0x1   :  { %8 = vsyncpa [#allocation4], 0 }
   0x2   :  { %10 = vsyncpa [#allocation4 + $0x1], 0  ;;  %s604_s9 = smov 0   ;;  %s606_s10 = smov 0  }
   0x3   :  { %s608_s11 = smov 0   ;;  %s610_s12 = smov 0  }
   0x4 LB: > { %s625_s13 = sadd.s32 4294967295, %s581_s12   ;;  %s407_s14 = sadd.s32 4294967294, %s581_s12   ;;  %s581_s12 = sphi %s610_s12, %s757_s12   ;;  %s577_s11 = sphi %s608_s11, %s756_s11   ;;  %s573_s10 = sphi %s606_s10, %s755_s10   ;;  %s569_s9 = sphi %s604_s9, %s754_s9  }
   0x5   : > { %s629_s15 = sadd.s32 1, %s581_s12   ;;  %s70_s16 = sadd.s32 1, %s577_s11 }
   0x6   : > { %s67_s17 = ssub.s32 %s581_s12, %s629_s15  ;;  %p80_p0 = scmp.ne.s32.totalorder %s577_s11, %s573_s10 }
   0x7   : > { %p68_p1 = scmp.eq.s32.totalorder %s67_s17, 0  ;;  %p81_p2 = scmp.eq.s32.totalorder %s625_s13, 1 }
   0x8   : > { %p86_p3 = scmp.ne.s32.totalorder %s573_s10, %s569_s9  ;;  %p87_p4 = scmp.eq.s32.totalorder %s407_s14, 1 }
   0x9   : > { %s640_s18 = scalar_select %p68_p1, %s577_s11, %s70_s16  }
   0xa   : > { %p642_p5 = por %p81_p2, %p80_p0  ;;  %p646_p6 = por %p87_p4, %p86_p3 }
   0xb   : > { %p408_p7 = scmp.ge.s32.totalorder %s581_s12, 1  ;;  %p94_p8 = scmp.lt.s32.totalorder %s581_s12, 3 }
   0xc   : > { %s745_s19 = scalar_select %p642_p5, 1, 0 }
   0xd   : > { %s746_s20 = scalar_select %p646_p6, 1, 0 }
   0xe   : > { %p742_p9 = scmp.eq.s32.totalorder %s625_s13, 0  ;;  %p653_p10 = pnand %p408_p7, %p94_p8 }
   0xf   : > { %s583_s22 = smov [#allocation2]   ;;  %s487_s27 = scalar_lea.hbm %s740_s1, 1024 }
  0x10   : > { %s747_s21 = scalar_select %p653_p10, 1, 0 }
  0x11   : > { %s106_s23 = sshll.u32 %s583_s22, 4  ;;  %p438_p11 = pneg %p653_p10  ;;  %s107_s23 = int_to_ptr.vmem [resolvable:$true] %s106_s23 }
  0x12   : > { %p488_p13 = scmp.ne.s32.totalorder %s740_s1, %s487_s27  ;;  %p494_p3 = scmp.lt.u32.totalorder %s487_s27, %s740_s1 }
  0x13   : > { %p661_p12 = pnand %p742_p9, %p438_p11 }
  0x15   : > { %p489_p0 = pneg %p661_p12 }
  0x17   : > { %p490_p1 = pnand %p489_p0, %p488_p13 }
  0x19   : > { %p491_p2 = pneg %p490_p1 }
  0x1b   : > { %p496_p4 = pnand %p494_p3, %p491_p2 }
  0x1d   : > { %499 = shalt.err (!%p496_p4)
}
  0x1e   : > { %s500_s4 = scalar_lea.vmem %s107_s23, 1024  ;;  %p508_p9 = scmp.lt.s32.totalorder %s107_s23, %s107_s23 }
  0x1f   : > { %p501_p7 = scmp.ne.s32.totalorder %s107_s23, %s500_s4  ;;  %p509_p6 = scmp.lt.s32.totalorder %s500_s4, %s500_s4 }
  0x21   : > { %p503_p8 = pnand %p501_p7, %p489_p0  ;;  %p510_p5 = por %p509_p6, %p508_p9 }
  0x23   : > { %p504_p11 = pneg %p503_p8 }
  0x25   : > { %p511_p10 = pnand %p510_p5, %p504_p11 }
  0x27   : > { %514 = shalt.err (!%p511_p10)
}
  0x28   : > { %s584_s5 = smov 512   ;;  %s585_s6 = smov 32  }
  0x29   : > { %441 = dma.hbm_to_vmem [thread:$0]  (!%p661_p12), %s740_s1, 1024, %s107_s23, [#allocation3], %s584_s5, %s584_s5, %s585_s6  }
  0x2a   : > { %p749_p13 = scmp.ne.s32.totalorder %s747_s21, 0 }
  0x2b   : > { %p750_p1 = scmp.eq.s32.totalorder (!%p749_p13), %s625_s13, 0 }
  0x2c   : > { %129 = sbr.rel (%p749_p13) target bundleno = 416 (0x1a0), region = 28 }
  0x33   : > { %560 = dma.done.wait (%p750_p1), [#allocation3], 1024   ;;  %p751_p0 = pmov %p750_p1 }
  0x34   : > { %p150_p5 = scmp.lt.s32.totalorder %s625_s13, 1  ;;  %v586_v0 = vmov 0   ;;  %v587_v1 = vmov 0.0   ;;  %v164_v3 = vld [vmem:[#allocation2 + $0x8] sm:$0xff]  ;;  %v166_v6 = vld [vmem:[#allocation2 + $0x18] sm:$0xff]  ;;  %v163_v8 = vld [vmem:[#allocation2] sm:$0xff]  ;;  %v155_v15 = vlaneseq }
  0x35   : > { %562 = vsyncadd (%p751_p0), [#allocation3], 4294966272  ;;  %486 = vset.pattern.permute.xlu0 %v586_v0  ;;  %239 = vmatprep.mubr.f32.mxu0 %v587_v1  ;;  %v168_v4 = vld [vmem:[#allocation2 + $0x28] sm:$0xff]  ;;  %v170_v7 = vld [vmem:[#allocation2 + $0x38] sm:$0xff]  ;;  %vm171_vm0 = vcmask 130048   ;;  %s147_s23 = sand.u32 1, %s573_s10  }
  0x36   : > { %s151_s14 = scalar_select %p150_p5, %s625_s13, 1  ;;  %310 = vmatprep.mubr.f32.mxu1 %v587_v1  ;;  %v424_v5 = vpack.c.bf16 %v168_v4, %v164_v3  ;;  %v428_v9 = vpack.c.bf16 %v170_v7, %v166_v6  ;;  %v167_v10 = vld [vmem:[#allocation2 + $0x20] sm:$0xff]  ;;  %v165_v11 = vld [vmem:[#allocation2 + $0x10] sm:$0xff]  ;;  %v156_v16 = vand.u32 127, %v155_v15 }
  0x37   : > { %v169_v12 = vld [vmem:[#allocation2 + $0x30] sm:$0xff]  ;;  %v426_v13 = vpack.c.bf16 %v167_v10, %v163_v8  ;;  %s413_s24 = sshll.u32 %s147_s23, 5  ;;  %s423_s27 = sshll.u32 %s625_s13, 9 }
  0x38   : > { %s414_s16 = sshll.u32 %s151_s14, 3  ;;  %425 = vmatprep.subr.bf16.mxu0 %v424_v5  ;;  %v430_v14 = vpack.c.bf16 %v169_v12, %v165_v11  ;;  %429 = vmatprep.subr.bf16.mxu1 %v428_v9  ;;  %s149_s25 = scalar_lea.vmem [#allocation5], %s413_s24 }
  0x39   : > { %s153_s21 = scalar_lea.vmem %s739_s0, %s414_s16  ;;  %427 = vmatpush1.bf16.msra.mxu0 %v426_v13  ;;  %s336_s26 = sshll.u32 %s149_s25, 4  ;;  %s694_s26 = int_to_ptr.vmem [resolvable:$true] %s336_s26 }
  0x3a   : > { %v154_v2 = vld [vmem:[%s153_s21] sm:$0xff]  ;;  %431 = vmatpush1.bf16.msra.mxu1 %v430_v14  ;;  %s699_s30 = scalar_lea.hbm %s741_s2, %s423_s27  ;;  %s322_s3 = scalar_lea.sflag [#allocation4], %s147_s23 }
  0x3b   : > { %158 = vperm.xlu0 %486, %v154_v2   ;;  %s515_s13 = scalar_lea.vmem %s694_s26, 512  ;;  %p752_p9 = scmp.ne.s32.totalorder %s745_s19, 0 }
  0x3c   : > { %p516_p6 = scmp.ne.s32.totalorder %s694_s26, %s515_s13  ;;  %s588_s4 = smov [#allocation5]  }
  0x3d   : > { %s519_s5 = sshll.u32 %s588_s4, 4  ;;  %s520_s5 = int_to_ptr.vmem [resolvable:$false] %s519_s5 }
  0x3e   : > { %p517_p10 = pnand %p516_p6, %p752_p9  ;;  %s521_s6 = scalar_lea.vmem %s520_s5, 1024 }
  0x3f   : > { %p522_p2 = scmp.lt.s32.totalorder %s694_s26, %s520_s5  ;;  %p523_p3 = scmp.lt.s32.totalorder %s521_s6, %s515_s13 }
  0x40   : > { %p518_p12 = pneg %p517_p10 }
  0x41   : > { %p524_p4 = por %p523_p3, %p522_p2 }
  0x43   : > { %p525_p7 = pnand %p524_p4, %p518_p12 }
  0xba   : > { %v159_v17 = vpop.permute.xlu0 %158 }
  0xbb   : > { %vm160_vm1 = vcmp.eq.s32.totalorder %v156_v16, %v159_v17 }
  0xbc   : > { %v415_v18 = vsel %vm160_vm1, 1.0, %v587_v1 }
  0xbd   : > { %416 = vmatmul.mubr.msk.f32.vlgmr.msra.gmra.mrb[0].mxu0 %vm171_vm0, %v415_v18  ;;  %417 = vmatmul.mubr.msk.f32.vlgmr.msra.gmra.mrb[0].mxu1 %vm171_vm0, %v415_v18 }
 0x190   : > { %v241_v19 = vpop.f32.mrb[0].mxu0  ;;  %v312_v20 = vpop.f32.mrb[0].mxu1 }
 0x191   : > { %317 = vst [vmem:[%s149_s25] sm:$0xff] %v241_v19  ;;  %319 = vst [vmem:[%s149_s25 + $0x10] sm:$0xff] %v312_v20  ;;  %v243_v21 = vpop.f32.mrb[1].mxu0  ;;  %v314_v22 = vpop.f32.mrb[1].mxu1 }
 0x192   : > { %318 = vst [vmem:[%s149_s25 + $0x8] sm:$0xff] %v243_v21  ;;  %320 = vst [vmem:[%s149_s25 + $0x18] sm:$0xff] %v314_v22 }
 0x193   : > { %528 = shalt.err (!%p525_p7)
}
 0x194   : > { %s529_s7 = scalar_lea.hbm %s699_s30, 512  ;;  %s533_s16 = scalar_lea.hbm %s741_s2, 1024 }
 0x195   : > { %p530_p8 = scmp.ne.s32.totalorder %s699_s30, %s529_s7  ;;  %p534_p1 = scmp.lt.u32.totalorder %s699_s30, %s741_s2 }
 0x196   : > { %p535_p0 = scmp.lt.u32.totalorder %s533_s16, %s529_s7  ;;  %p537_p6 = scmp.lt.u32.totalorder %s529_s7, %s699_s30 }
 0x197   : > { %p531_p11 = pnand %p530_p8, %p752_p9 }
 0x198   : > { %p536_p5 = por %p535_p0, %p534_p1 }
 0x199   : > { %p532_p13 = pneg %p531_p11 }
 0x19a   : > { %p538_p10 = por %p537_p6, %p536_p5 }
 0x19c   : > { %p539_p12 = pnand %p538_p10, %p532_p13 }
 0x19e   : > { %542 = shalt.err (!%p539_p12)
}
 0x19f   : > { %436 = dma.vmem_to_hbm [thread:$0]  (%p752_p9), %s694_s26, 512, %s699_s30, %s322_s3  }
 0x1a0 PF: > { %p448_p2 = scmp.ge.s32.totalorder %s581_s12, 2  ;;  %s348_s21 = sand.u32 1, %s569_s9  }
 0x1a1   : > { %p753_p3 = scmp.ne.s32.totalorder %s746_s20, 0  ;;  %s349_s23 = scalar_lea.sflag [#allocation4], %s348_s21 }
 0x1a3   : > { %p443_p4 = pnand %p448_p2, %p753_p3 }
 0x1a5   : > { %564 = dma.done.wait (!%p443_p4), %s349_s23, 512  }
 0x1a6   : > { %566 = vsyncadd (!%p443_p4), %s349_s23, 4294966784  ;;  %p13_p7 = scmp.ge.s32.totalorder %s629_s15, 4   ;;  %s754_s9 = smov %s573_s10 }
 0x1a7   : > { %s755_s10 = smov %s577_s11  ;;  %s756_s11 = smov %s640_s18 }
 0x1a8   : > { %s757_s12 = smov %s629_s15  ;;  %15 = sbr.rel (!%p13_p7) target bundleno = 4 (0x4), region = 68 }
 0x1af   :  { %354 = vsyncpa [#allocation3], 1 }
 0x1b0   :  { %356 = vsyncpa [#allocation3 + $0x1], 1 }
 0x1b1   :  { %357 = vsyncpa [#allocation4], 1 }
 0x1b2   :  { %359 = vsyncpa [#allocation4 + $0x1], 1 }

</bundles_post_ra>
